<compile_context>
chip_gen: v5e
topology: v5e:2x2
jax: 0.10.0
libtpu: 0.0.40
codegen_flags: <defaults>
</compile_context>

<pallas_src>
import jax
import jax.numpy as jnp
from jax import lax
from jax.experimental import pallas as pl
from jax.experimental.pallas import tpu as pltpu

LANE = 128                              # lane-dense width of the padded MLP head
SMALL_VOCAB_TABLE_BYTES = 4 * 1024 * 1024   # resident-table fast-path threshold


# ----------------------------------------------------------------------------
# Kernel 1: small-vocab fast path — embedding table resident in VMEM,
#           pool is one matmul over the table (no per-row DMAs at all).
# ----------------------------------------------------------------------------
def _resident_table_kernel(counts_ref,                 # VMEM (B, V)  normalized bag counts
                           emb_ref,                    # VMEM (V, D)  full embedding table
                           w1_ref, b1_ref,             # VMEM (D,128), (1,128)
                           w2_ref, b2_ref,             # VMEM (128,128), (1,128)
                           w34_ref, b34_ref,           # VMEM (128,128), (1,128)
                           out_ref):                   # VMEM (B, 128)
    embedded = jnp.dot(counts_ref[...], emb_ref[...],
                       preferred_element_type=jnp.float32)        # (B, D)
    h1 = jnp.dot(embedded, w1_ref[...],
                 preferred_element_type=jnp.float32) + b1_ref[...]
    h1 = jnp.maximum(h1, 0.0)
    h2 = jnp.dot(h1, w2_ref[...],
                 preferred_element_type=jnp.float32) + b2_ref[...]
    h2 = jnp.maximum(h2, 0.0)
    out_ref[...] = jnp.dot(h2, w34_ref[...],
                           preferred_element_type=jnp.float32) + b34_ref[...]


# ----------------------------------------------------------------------------
# Kernel 2: general path — chunked, double-buffered HBM row gather with
#           on-chip mean-pool accumulation; MLP head runs on the last chunk.
# Grid axis = chunk index ("arbitrary": carries the accumulator).
# ----------------------------------------------------------------------------
def _gather_pool_mlp_kernel(text_ref,                  # SMEM (L_pad,) int32 (scalar prefetch)
                            lo_ref, hi_ref, invc_ref,  # VMEM (B,1) i32 / i32 / f32
                            w1_ref, b1_ref,            # VMEM (D,128), (1,128)
                            w2_ref, b2_ref,            # VMEM (128,128), (1,128)
                            w34_ref, b34_ref,          # VMEM (128,128), (1,128)
                            emb_hbm,                   # HBM  (V, D) embedding table
                            out_ref,                   # VMEM (B, 128)
                            gbuf,                      # VMEM scratch (2, CHUNK, D)
                            sems,                      # DMA sems (2, CHUNK)
                            acc):                      # VMEM scratch (B, D) pool accumulator
    k = pl.program_id(0)
    nk = pl.num_programs(0)
    chunk = gbuf.shape[1]
    b = acc.shape[0]

    def issue_chunk(chunk_idx, slot):
        base = chunk_idx * chunk

        def body(i, carry):
            tok = text_ref[base + i]
            pltpu.make_async_copy(emb_hbm.at[tok], gbuf.at[slot, i],
                                  sems.at[slot, i]).start()
            return carry

        lax.fori_loop(0, chunk, body, 0, unroll=8)

    def wait_chunk(slot):
        def body(i, carry):
            # src arg only sizes the wait; the real source was set at start().
            pltpu.make_async_copy(emb_hbm.at[0], gbuf.at[slot, i],
                                  sems.at[slot, i]).wait()
            return carry

        lax.fori_loop(0, chunk, body, 0, unroll=8)

    # Prime: zero the accumulator and start chunk 0 into slot 0.
    @pl.when(k == 0)
    def _():
        acc[...] = jnp.zeros_like(acc)
        issue_chunk(0, 0)

    slot = k % 2

    # Prefetch the next chunk into the other slot before touching this one.
    @pl.when(k + 1 < nk)
    def _():
        issue_chunk(k + 1, 1 - slot)

    wait_chunk(slot)

    # Per-chunk bag-mean weights built on-chip (no (B, L) HBM transfer):
    # token position p belongs to bag j iff lo[j] <= p < hi[j]; weight 1/|bag|.
    pos = k * chunk + lax.broadcasted_iota(jnp.int32, (b, chunk), 1)
    member = jnp.logical_and(pos >= lo_ref[...], pos < hi_ref[...])
    bag_w = member.astype(jnp.float32) * invc_ref[...]             # (B, CHUNK)

    acc[...] += jnp.dot(bag_w, gbuf[slot],
                        preferred_element_type=jnp.float32)        # (B, D)

    # MLP head only once, after the final chunk.
    @pl.when(k == nk - 1)
    def _():
        h1 = jnp.dot(acc[...], w1_ref[...],
                     preferred_element_type=jnp.float32) + b1_ref[...]
        h1 = jnp.maximum(h1, 0.0)
        h2 = jnp.dot(h1, w2_ref[...],
                     preferred_element_type=jnp.float32) + b2_ref[...]
        h2 = jnp.maximum(h2, 0.0)
        out_ref[...] = jnp.dot(h2, w34_ref[...],
                               preferred_element_type=jnp.float32) + b34_ref[...]


# ----------------------------------------------------------------------------
# Parameters
# ----------------------------------------------------------------------------
def init_params(key, vocab_size, embed_dim=64, num_class=5):
    """Deterministic parameter init mirroring the module's init_weights().
    Linear weights are stored transposed, (in, out), so y = x @ W + b."""
    k = jax.random.split(key, 8)
    initrange = 0.5
    hidden = num_class * 2
    mid = max(num_class // 2, 1)
    return {
        "emb": jax.random.uniform(k[0], (vocab_size, embed_dim),
                                  jnp.float32, -initrange, initrange),
        "w1": jax.random.uniform(k[1], (embed_dim, hidden),
                                 jnp.float32, -initrange, initrange),
        "b1": jnp.zeros((1, hidden), jnp.float32),
        "w2": jax.random.uniform(k[2], (hidden, num_class), jnp.float32,
                                 -1.0 / hidden ** 0.5, 1.0 / hidden ** 0.5),
        "b2": jax.random.uniform(k[3], (1, num_class), jnp.float32,
                                 -1.0 / hidden ** 0.5, 1.0 / hidden ** 0.5),
        "w3": jax.random.uniform(k[4], (num_class, mid), jnp.float32,
                                 -1.0 / num_class ** 0.5, 1.0 / num_class ** 0.5),
        "b3": jax.random.uniform(k[5], (1, mid), jnp.float32,
                                 -1.0 / num_class ** 0.5, 1.0 / num_class ** 0.5),
        "w4": jax.random.uniform(k[6], (mid, num_class), jnp.float32,
                                 -1.0 / mid ** 0.5, 1.0 / mid ** 0.5),
        "b4": jax.random.uniform(k[7], (1, num_class), jnp.float32,
                                 -1.0 / mid ** 0.5, 1.0 / mid ** 0.5),
    }


def prepare_params(params, num_class=5):
    """One-time setup: fuse fc3@fc4 (no nonlinearity between them) and zero-pad
    the whole head to 128 lanes (lane-dense matmuls / stores). Padding is zeros
    so the wrapper's [:, :num_class] slice is bit-identical math."""
    D = params["emb"].shape[1]
    H = num_class * 2
    C = num_class
    w34 = params["w3"] @ params["w4"]                    # (C, C)
    b34 = params["b3"] @ params["w4"] + params["b4"]     # (1, C)
    return {
        "emb": params["emb"],
        "w1p": jnp.zeros((D, LANE), jnp.float32).at[:, :H].set(params["w1"]),
        "b1p": jnp.zeros((1, LANE), jnp.float32).at[:, :H].set(params["b1"]),
        "w2p": jnp.zeros((LANE, LANE), jnp.float32).at[:H, :C].set(params["w2"]),
        "b2p": jnp.zeros((1, LANE), jnp.float32).at[:, :C].set(params["b2"]),
        "w34p": jnp.zeros((LANE, LANE), jnp.float32).at[:C, :C].set(w34),
        "b34p": jnp.zeros((1, LANE), jnp.float32).at[:, :C].set(b34),
    }


# ----------------------------------------------------------------------------
# Wrapper
# ----------------------------------------------------------------------------
def _bag_mean_matrix(offsets, seq_len, num_bags):
    """(B, L) matrix W with W[b, i] = 1/|bag b| if token i is in bag b.
    Assumes offsets[0] == 0 and non-decreasing offsets (EmbeddingBag contract).
    Empty bags yield a zero row (matches PyTorch mean mode)."""
    pos = jnp.arange(seq_len)[None, :]
    bag_id = jnp.sum(pos >= offsets[:, None].astype(jnp.int32), axis=0) - 1
    member = (bag_id[None, :] == jnp.arange(num_bags)[:, None]).astype(jnp.float32)
    counts = jnp.maximum(member.sum(axis=1, keepdims=True), 1.0)
    return member / counts


def _lane_pad(n):
    return ((n + LANE - 1) // LANE) * LANE


def text_classification_forward(text, offsets, prepared, num_class=5,
                                *, force_gather=False, chunk=None):
    emb = prepared["emb"]
    V, D = emb.shape
    L = text.shape[0]
    B = offsets.shape[0]
    # Clamp ids: PyTorch raises on OOB; here an OOB id must not become an
    # unchecked DMA index (documented behavioural difference).
    text = jnp.clip(text.astype(jnp.int32), 0, V - 1)
    offsets = offsets.astype(jnp.int32)

    weights = (prepared["w1p"], prepared["b1p"], prepared["w2p"],
               prepared["b2p"], prepared["w34p"], prepared["b34p"])

    table_vmem_bytes = V * _lane_pad(D) * 4              # lane-padded footprint

    # ---------------- small-vocab fast path: table resident in VMEM ----------
    if (not force_gather) and table_vmem_bytes <= SMALL_VOCAB_TABLE_BYTES:
        bagw = _bag_mean_matrix(offsets, L, B)                              # (B, L)
        counts = bagw @ jax.nn.one_hot(text, V, dtype=jnp.float32)          # (B, V)
        fixed = lambda i: (0, 0)
        out = pl.pallas_call(
            _resident_table_kernel,
            out_shape=jax.ShapeDtypeStruct((B, LANE), jnp.float32),
            grid=(1,),
            in_specs=[pl.BlockSpec((B, V), fixed),
                      pl.BlockSpec((V, D), fixed),
                      pl.BlockSpec((D, LANE), fixed),
                      pl.BlockSpec((1, LANE), fixed),
                      pl.BlockSpec((LANE, LANE), fixed),
                      pl.BlockSpec((1, LANE), fixed),
                      pl.BlockSpec((LANE, LANE), fixed),
                      pl.BlockSpec((1, LANE), fixed)],
            out_specs=pl.BlockSpec((B, LANE), fixed),
            compiler_params=pltpu.CompilerParams(
                dimension_semantics=("arbitrary",)),
        )(counts, emb, *weights)
        return out[:, :num_class]

    # ---------------- general path: chunked double-buffered HBM gather -------
    if chunk is None:
        # Bounded in-flight DMA depth / VMEM footprint; tunable per chip.
        chunk = min(64, ((L + 7) // 8) * 8)
    chunk = max(8, ((chunk + 7) // 8) * 8)
    l_pad = ((L + chunk - 1) // chunk) * chunk
    num_chunks = l_pad // chunk
    text_pad = jnp.zeros((l_pad,), jnp.int32).at[:L].set(text)   # pad ids -> 0, weight 0

    lo = offsets.reshape(B, 1)                                              # (B,1) i32
    hi = jnp.concatenate([offsets[1:], jnp.array([L], jnp.int32)]).reshape(B, 1)
    invc = 1.0 / jnp.maximum(hi - lo, 1).astype(jnp.float32)                # (B,1) f32

    fixed = lambda k, ids: (0, 0)   # scalar-prefetch ref is a positional arg

    # Explicit VMEM budget: bounded scratch + double-buffered resident weights
    # + headroom. Stays inside v5e's 16 MiB scoped default and v7x's 64 MiB.
    vmem_limit = int(
        4 * (2 * chunk * _lane_pad(D) + B * _lane_pad(D))           # gather ring + acc
        + 4 * 2 * (D * LANE + 2 * LANE * LANE + 3 * LANE + 3 * B + B * LANE)
        + (8 << 20))

    out = pl.pallas_call(
        _gather_pool_mlp_kernel,
        out_shape=jax.ShapeDtypeStruct((B, LANE), jnp.float32),
        grid_spec=pltpu.PrefetchScalarGridSpec(
            num_scalar_prefetch=1,                      # token ids -> SMEM
            grid=(num_chunks,),
            in_specs=[
                pl.BlockSpec((B, 1), fixed),            # bag start
                pl.BlockSpec((B, 1), fixed),            # bag end
                pl.BlockSpec((B, 1), fixed),            # 1 / |bag|
                pl.BlockSpec((D, LANE), fixed),          # w1 (padded, VMEM-resident)
                pl.BlockSpec((1, LANE), fixed),          # b1
                pl.BlockSpec((LANE, LANE), fixed),       # w2
                pl.BlockSpec((1, LANE), fixed),          # b2
                pl.BlockSpec((LANE, LANE), fixed),       # w3@w4 fused
                pl.BlockSpec((1, LANE), fixed),          # b3@w4+b4 fused
                pl.BlockSpec(memory_space=pl.ANY),       # embedding table in HBM
            ],
            out_specs=pl.BlockSpec((B, LANE), fixed),
            scratch_shapes=[
                pltpu.VMEM((2, chunk, D), jnp.float32),  # double-buffered gather rows
                pltpu.SemaphoreType.DMA((2, chunk)),     # bounded per-row semaphores
                pltpu.VMEM((B, D), jnp.float32),         # mean-pool accumulator
            ],
        ),
        compiler_params=pltpu.CompilerParams(
            dimension_semantics=("arbitrary",),          # chunk axis carries the accumulator
            vmem_limit_bytes=vmem_limit),
    )(text_pad, lo, hi, invc, *weights, emb)

    return out[:, :num_class]


# ----------------------------------------------------------------------------
# Pure-JAX reference (unfused, unpadded) for sanity checking.
# ----------------------------------------------------------------------------
def _reference_forward(text, offsets, params):
    text = text.astype(jnp.int32)
    L = text.shape[0]
    B = offsets.shape[0]
    bagw = _bag_mean_matrix(offsets.astype(jnp.int32), L, B)
    embedded = bagw @ params["emb"][text]
    h1 = jnp.maximum(embedded @ params["w1"] + params["b1"], 0.0)
    h2 = jnp.maximum(h1 @ params["w2"] + params["b2"], 0.0)
    h3 = h2 @ params["w3"] + params["b3"]
    return h3 @ params["w4"] + params["b4"]


if __name__ == "__main__":
    key = jax.random.PRNGKey(0)
    kp1, kp2, kt1, kt2 = jax.random.split(key, 4)

    # Test 1: module-spec shapes -> small-vocab resident-table kernel.
    vocab_size, embed_dim, num_class = 32, 64, 5
    seq_len, num_bags = 8, 2
    params = init_params(kp1, vocab_size, embed_dim, num_class)
    prepared = prepare_params(params, num_class)
    text = jax.random.randint(kt1, (seq_len,), 0, vocab_size, dtype=jnp.int32)
    offsets = jnp.array([0, 3], dtype=jnp.int32)      # bag0: tokens 0..2, bag1: 3..7

    out = jax.block_until_ready(
        text_classification_forward(text, offsets, prepared, num_class))
    ref = _reference_forward(text, offsets, params)
    assert out.shape == (num_bags, num_class)
    assert jnp.allclose(out, ref, atol=1e-4, rtol=1e-5), \
        float(jnp.max(jnp.abs(out - ref)))

    # Test 2: force the chunked, double-buffered HBM gather path (3 chunks).
    vocab2, seq2, bags2 = 512, 40, 4
    params2 = init_params(kp2, vocab2, embed_dim, num_class)
    prepared2 = prepare_params(params2, num_class)
    text2 = jax.random.randint(kt2, (seq2,), 0, vocab2, dtype=jnp.int32)
    offsets2 = jnp.array([0, 7, 19, 33], dtype=jnp.int32)

    out2 = jax.block_until_ready(
        text_classification_forward(text2, offsets2, prepared2, num_class,
                                    force_gather=True, chunk=16))
    ref2 = _reference_forward(text2, offsets2, params2)
    assert out2.shape == (bags2, num_class)
    assert jnp.allclose(out2, ref2, atol=1e-4, rtol=1e-5), \
        float(jnp.max(jnp.abs(out2 - ref2)))

    print("KERNEL_OK")
</pallas_src>

<mosaic_0001>
module attributes {stable_mosaic.version = 11 : i64} {
  func.func @_resident_table_kernel(%arg0: i32, %arg1: memref<2x32xf32, #tpu.memory_space<vmem>>, %arg2: memref<32x64xf32, #tpu.memory_space<vmem>>, %arg3: memref<64x128xf32, #tpu.memory_space<vmem>>, %arg4: memref<1x128xf32, #tpu.memory_space<vmem>>, %arg5: memref<128x128xf32, #tpu.memory_space<vmem>>, %arg6: memref<1x128xf32, #tpu.memory_space<vmem>>, %arg7: memref<128x128xf32, #tpu.memory_space<vmem>>, %arg8: memref<1x128xf32, #tpu.memory_space<vmem>>, %arg9: memref<2x128xf32, #tpu.memory_space<vmem>>) attributes {dimension_semantics = [#tpu.dimension_semantics<arbitrary>], iteration_bounds = array<i64: 1>, scalar_prefetch = 0 : i64, scratch_operands = 0 : i64, tpu.core_type = #tpu.core_type<tc>, window_params = [{pipeline_mode = #tpu.pipeline_mode<synchronous>, transform_indices = @transform_0, window_bounds = array<i64: 2, 32>}, {pipeline_mode = #tpu.pipeline_mode<synchronous>, transform_indices = @transform_1, window_bounds = array<i64: 32, 64>}, {pipeline_mode = #tpu.pipeline_mode<synchronous>, transform_indices = @transform_2, window_bounds = array<i64: 64, 128>}, {pipeline_mode = #tpu.pipeline_mode<synchronous>, transform_indices = @transform_3, window_bounds = array<i64: 1, 128>}, {pipeline_mode = #tpu.pipeline_mode<synchronous>, transform_indices = @transform_4, window_bounds = array<i64: 128, 128>}, {pipeline_mode = #tpu.pipeline_mode<synchronous>, transform_indices = @transform_5, window_bounds = array<i64: 1, 128>}, {pipeline_mode = #tpu.pipeline_mode<synchronous>, transform_indices = @transform_6, window_bounds = array<i64: 128, 128>}, {pipeline_mode = #tpu.pipeline_mode<synchronous>, transform_indices = @transform_7, window_bounds = array<i64: 1, 128>}, {pipeline_mode = #tpu.pipeline_mode<synchronous>, transform_indices = @transform_8, window_bounds = array<i64: 2, 128>}]} {
    %c0 = arith.constant 0 : index
    %c0_0 = arith.constant 0 : index
    %0 = vector.load %arg1[%c0, %c0_0] : memref<2x32xf32, #tpu.memory_space<vmem>>, vector<2x32xf32>
    %c0_1 = arith.constant 0 : index
    %c0_2 = arith.constant 0 : index
    %1 = vector.load %arg2[%c0_1, %c0_2] : memref<32x64xf32, #tpu.memory_space<vmem>>, vector<32x64xf32>
    %cst = arith.constant dense<0.000000e+00> : vector<2x64xf32>
    %2 = tpu.matmul %0, %1, %cst {dimension_numbers = #tpu.dot_dimension_numbers<[1], [0], [0], [1], [0, 0, 1, 1], [], []>} : vector<2x32xf32>, vector<32x64xf32>, vector<2x64xf32> -> vector<2x64xf32>
    %c0_3 = arith.constant 0 : index
    %c0_4 = arith.constant 0 : index
    %3 = vector.load %arg3[%c0_3, %c0_4] : memref<64x128xf32, #tpu.memory_space<vmem>>, vector<64x128xf32>
    %cst_5 = arith.constant dense<0.000000e+00> : vector<2x128xf32>
    %4 = tpu.matmul %2, %3, %cst_5 {dimension_numbers = #tpu.dot_dimension_numbers<[1], [0], [0], [1], [0, 0, 1, 1], [], []>} : vector<2x64xf32>, vector<64x128xf32>, vector<2x128xf32> -> vector<2x128xf32>
    %c0_6 = arith.constant 0 : index
    %c0_7 = arith.constant 0 : index
    %5 = vector.load %arg4[%c0_6, %c0_7] : memref<1x128xf32, #tpu.memory_space<vmem>>, vector<1x128xf32>
    %6 = vector.broadcast %5 : vector<1x128xf32> to vector<2x128xf32>
    %7 = arith.addf %4, %6 : vector<2x128xf32>
    %cst_8 = arith.constant 0.000000e+00 : f32
    %8 = vector.broadcast %cst_8 : f32 to vector<2x128xf32>
    %9 = arith.maximumf %7, %8 : vector<2x128xf32>
    %c0_9 = arith.constant 0 : index
    %c0_10 = arith.constant 0 : index
    %10 = vector.load %arg5[%c0_9, %c0_10] : memref<128x128xf32, #tpu.memory_space<vmem>>, vector<128x128xf32>
    %cst_11 = arith.constant dense<0.000000e+00> : vector<2x128xf32>
    %11 = tpu.matmul %9, %10, %cst_11 {dimension_numbers = #tpu.dot_dimension_numbers<[1], [0], [0], [1], [0, 0, 1, 1], [], []>} : vector<2x128xf32>, vector<128x128xf32>, vector<2x128xf32> -> vector<2x128xf32>
    %c0_12 = arith.constant 0 : index
    %c0_13 = arith.constant 0 : index
    %12 = vector.load %arg6[%c0_12, %c0_13] : memref<1x128xf32, #tpu.memory_space<vmem>>, vector<1x128xf32>
    %13 = vector.broadcast %12 : vector<1x128xf32> to vector<2x128xf32>
    %14 = arith.addf %11, %13 : vector<2x128xf32>
    %cst_14 = arith.constant 0.000000e+00 : f32
    %15 = vector.broadcast %cst_14 : f32 to vector<2x128xf32>
    %16 = arith.maximumf %14, %15 : vector<2x128xf32>
    %c0_15 = arith.constant 0 : index
    %c0_16 = arith.constant 0 : index
    %17 = vector.load %arg7[%c0_15, %c0_16] : memref<128x128xf32, #tpu.memory_space<vmem>>, vector<128x128xf32>
    %cst_17 = arith.constant dense<0.000000e+00> : vector<2x128xf32>
    %18 = tpu.matmul %16, %17, %cst_17 {dimension_numbers = #tpu.dot_dimension_numbers<[1], [0], [0], [1], [0, 0, 1, 1], [], []>} : vector<2x128xf32>, vector<128x128xf32>, vector<2x128xf32> -> vector<2x128xf32>
    %c0_18 = arith.constant 0 : index
    %c0_19 = arith.constant 0 : index
    %19 = vector.load %arg8[%c0_18, %c0_19] : memref<1x128xf32, #tpu.memory_space<vmem>>, vector<1x128xf32>
    %20 = vector.broadcast %19 : vector<1x128xf32> to vector<2x128xf32>
    %21 = arith.addf %18, %20 : vector<2x128xf32>
    %c0_20 = arith.constant 0 : index
    %c0_21 = arith.constant 0 : index
    %22 = vector.load %arg9[%c0_20, %c0_21] : memref<2x128xf32, #tpu.memory_space<vmem>>, vector<2x128xf32>
    tpu.vector_store %arg9[%c0_20, %c0_21], %21 {strides = array<i32>} : memref<2x128xf32, #tpu.memory_space<vmem>>, vector<2x128xf32>,
    return
  }
  func.func @transform_0(%arg0: i32) -> (i32, i32) {
    %c0_i32 = arith.constant 0 : i32
    %c0_i32_0 = arith.constant 0 : i32
    %c0_i32_1 = arith.constant 0 : i32
    return %c0_i32, %c0_i32_0 : i32, i32
  }
  func.func @transform_1(%arg0: i32) -> (i32, i32) {
    %c0_i32 = arith.constant 0 : i32
    %c0_i32_0 = arith.constant 0 : i32
    %c0_i32_1 = arith.constant 0 : i32
    return %c0_i32, %c0_i32_0 : i32, i32
  }
  func.func @transform_2(%arg0: i32) -> (i32, i32) {
    %c0_i32 = arith.constant 0 : i32
    %c0_i32_0 = arith.constant 0 : i32
    %c0_i32_1 = arith.constant 0 : i32
    return %c0_i32, %c0_i32_0 : i32, i32
  }
  func.func @transform_3(%arg0: i32) -> (i32, i32) {
    %c0_i32 = arith.constant 0 : i32
    %c0_i32_0 = arith.constant 0 : i32
    %c0_i32_1 = arith.constant 0 : i32
    return %c0_i32, %c0_i32_0 : i32, i32
  }
  func.func @transform_4(%arg0: i32) -> (i32, i32) {
    %c0_i32 = arith.constant 0 : i32
    %c0_i32_0 = arith.constant 0 : i32
    %c0_i32_1 = arith.constant 0 : i32
    return %c0_i32, %c0_i32_0 : i32, i32
  }
  func.func @transform_5(%arg0: i32) -> (i32, i32) {
    %c0_i32 = arith.constant 0 : i32
    %c0_i32_0 = arith.constant 0 : i32
    %c0_i32_1 = arith.constant 0 : i32
    return %c0_i32, %c0_i32_0 : i32, i32
  }
  func.func @transform_6(%arg0: i32) -> (i32, i32) {
    %c0_i32 = arith.constant 0 : i32
    %c0_i32_0 = arith.constant 0 : i32
    %c0_i32_1 = arith.constant 0 : i32
    return %c0_i32, %c0_i32_0 : i32, i32
  }
  func.func @transform_7(%arg0: i32) -> (i32, i32) {
    %c0_i32 = arith.constant 0 : i32
    %c0_i32_0 = arith.constant 0 : i32
    %c0_i32_1 = arith.constant 0 : i32
    return %c0_i32, %c0_i32_0 : i32, i32
  }
  func.func @transform_8(%arg0: i32) -> (i32, i32) {
    %c0_i32 = arith.constant 0 : i32
    %c0_i32_0 = arith.constant 0 : i32
    %c0_i32_1 = arith.constant 0 : i32
    return %c0_i32, %c0_i32_0 : i32, i32
  }
}

</mosaic_0001>

<bundles_post_ra>
// kernel: tpu_custom_call.1
= control target key start
LH: loop header
LB: loop body
LE: loop exit
PB: predicated region body
PF: predicated region fallthrough
CT: control target
= control target key end

     0   :  { %13 = vsyncpa [#allocation3], 0  ;;  %s518_s0 = inlined_call_operand.hbm [shape: f32[2,32], index: 0, kind: input, shape index: {}]   ;;  %s519_s1 = inlined_call_operand.hbm [shape: f32[32,64], index: 1, kind: input, shape index: {}]   ;;  %s520_s2 = inlined_call_operand.hbm [shape: f32[64,128], index: 2, kind: input, shape index: {}]   ;;  %s521_s3 = inlined_call_operand.vmem [shape: f32[1,128], index: 3, kind: input, shape index: {}]   ;;  %s522_s4 = inlined_call_operand.hbm [shape: f32[128,128], index: 4, kind: input, shape index: {}]   ;;  %s523_s5 = inlined_call_operand.vmem [shape: f32[1,128], index: 5, kind: input, shape index: {}]   ;;  %s524_s6 = inlined_call_operand.hbm [shape: f32[128,128], index: 6, kind: input, shape index: {}]   ;;  %s525_s7 = inlined_call_operand.vmem [shape: f32[1,128], index: 7, kind: input, shape index: {}]   ;;  %s526_s8 = inlined_call_operand.hbm [shape: f32[2,128], index: 8, kind: output, shape index: {}]  }
   0x1   :  { %14 = vsyncpa [#allocation6], 0 }
   0x2   :  { %15 = vsyncpa [#allocation9], 0  ;;  %s32_s29 = sshll.u32 %s519_s1, 4  ;;  %s33_s29 = int_to_ptr.hbm [resolvable:$true] %s32_s29 }
   0x3   :  { %16 = vsyncpa [#allocation4], 0  ;;  %s438_s30 = smov [#allocation5]   ;;  %s60_s12 = sshll.u32 %s522_s4, 4  ;;  %s61_s12 = int_to_ptr.hbm [resolvable:$true] %s60_s12 }
   0x4   :  { %s34_s9 = sshll.u32 %s438_s30, 4  ;;  %s439_s13 = smov 128   ;;  %s35_s9 = int_to_ptr.vmem [resolvable:$true] %s34_s9 }
   0x5   :  { %s440_s14 = smov 8   ;;  %s441_s15 = smov [#allocation8]  }
   0x6   :  { %40 = dma.hbm_to_vmem [thread:$0]  %s33_s29, 512, %s35_s9, [#allocation6], %s439_s13, %s439_s13, %s440_s14  }
   0x7   :  { %s62_s16 = sshll.u32 %s441_s15, 4  ;;  %s22_s19 = sshll.u32 %s518_s0, 4  ;;  %s63_s16 = int_to_ptr.vmem [resolvable:$true] %s62_s16  ;;  %s23_s19 = int_to_ptr.hbm [resolvable:$true] %s22_s19 }
   0x8   :  { %68 = dma.hbm_to_vmem [thread:$0]  %s61_s12, 2048, %s63_s16, [#allocation9], %s439_s13, %s439_s13, %s440_s14  }
   0x9   :  { %s45_s21 = sshll.u32 %s520_s2, 4  ;;  %s442_s22 = smov [#allocation2]   ;;  %s46_s21 = int_to_ptr.hbm [resolvable:$true] %s45_s21 }
   0xa   :  { %s24_s23 = sshll.u32 %s442_s22, 4  ;;  %s443_s4 = smov [#allocation7]   ;;  %s25_s23 = int_to_ptr.vmem [resolvable:$true] %s24_s23 }
   0xb   :  { %27 = dma.hbm_to_vmem [thread:$0]  %s23_s19, 32, %s25_s23, [#allocation3]  }
   0xc   :  { %s47_s24 = sshll.u32 %s443_s4, 4  ;;  %s75_s27 = sshll.u32 %s524_s6, 4  ;;  %s48_s24 = int_to_ptr.vmem [resolvable:$true] %s47_s24  ;;  %s76_s27 = int_to_ptr.hbm [resolvable:$true] %s75_s27 }
   0xd   :  { %53 = dma.hbm_to_vmem [thread:$0]  %s46_s21, 1024, %s48_s24, [#allocation6], %s439_s13, %s439_s13, %s440_s14  }
   0xe   :  { %s444_s0 = smov [#allocation10]  }
   0xf   :  { %s77_s28 = sshll.u32 %s444_s0, 4  ;;  %s78_s28 = int_to_ptr.vmem [resolvable:$true] %s77_s28 }
  0x10   :  { %83 = dma.hbm_to_vmem [thread:$0]  %s76_s27, 2048, %s78_s28, [#allocation9], %s439_s13, %s439_s13, %s440_s14  }
  0x11   :  { %430 = dma.done.wait [#allocation3], 32  }
  0x12   :  { %431 = vsyncadd [#allocation3], 4294967264 }
  0x13   :  { %432 = dma.done.wait [#allocation6], 1536  }
  0x14   :  { %433 = vsyncadd [#allocation6], 4294965760 }
  0x15   :  { %434 = dma.done.wait [#allocation9], 4096  }
  0x16   :  { %435 = vsyncadd [#allocation9], 4294963200  ;;  %v110_v0 = vld [vmem:[#allocation5 + $0x18] sm:$0xff]  ;;  %v109_v1 = vld [vmem:[#allocation5 + $0x10] sm:$0xff]  ;;  %vm111_vm0 = vcmask 261120   ;;  %vm147_vm1 = vcmask 523264  }
  0x17   :  { %127 = vmatpush.msra.mxu0 %v110_v0  ;;  %v142_v2 = vld [vmem:[#allocation7 + $0x38] sm:$0xff]  ;;  %v108_v3 = vld [vmem:[#allocation5 + $0x8] sm:$0xff]  ;;  %v141_v4 = vld [vmem:[#allocation7 + $0x30] sm:$0xff]  ;;  %s445_s10 = smov [#allocation11]   ;;  %s261_s14 = sshll.u32 %s526_s8, 4  ;;  %s262_s14 = int_to_ptr.hbm [resolvable:$true] %s261_s14 }
  0x18   :  { %159 = vmatpush.msra.mxu1 %v142_v2  ;;  %v107_v5 = vld [vmem:[#allocation5] sm:$0xff]  ;;  %v140_v6 = vld [vmem:[#allocation7 + $0x28] sm:$0xff]  ;;  %v106_v7 = vld [vmem:[#allocation2] sm:$0x3]  ;;  %s259_s11 = sshll.u32 %s445_s10, 4  ;;  %s260_s11 = int_to_ptr.vmem [resolvable:$true] %s259_s11 }
  0x19   :  { %128 = vmatpush.msra.mxu0 %v109_v1  ;;  %v139_v8 = vld [vmem:[#allocation7 + $0x20] sm:$0xff]  ;;  %v138_v9 = vld [vmem:[#allocation7 + $0x18] sm:$0xff]  ;;  %v137_v10 = vld [vmem:[#allocation7 + $0x10] sm:$0xff] }
  0x1a   :  { %160 = vmatpush.msra.mxu1 %v141_v4  ;;  %v136_v11 = vld [vmem:[#allocation7 + $0x8] sm:$0xff]  ;;  %v135_v12 = vld [vmem:[#allocation7] sm:$0xff]  ;;  %v187_v13 = vld [vmem:[#allocation8 + $0x78] sm:$0xff] }
  0x1b   :  { %129 = vmatpush.msra.mxu0 %v108_v3  ;;  %v186_v14 = vld [vmem:[#allocation8 + $0x70] sm:$0xff]  ;;  %192 = vmatpush.msra.mxu2 %v187_v13  ;;  %v185_v15 = vld [vmem:[#allocation8 + $0x68] sm:$0xff]  ;;  %v184_v16 = vld [vmem:[#allocation8 + $0x60] sm:$0xff] }
  0x1c   :  { %161 = vmatpush.msra.mxu1 %v140_v6  ;;  %v183_v17 = vld [vmem:[#allocation8 + $0x58] sm:$0xff]  ;;  %v182_v18 = vld [vmem:[#allocation8 + $0x50] sm:$0xff]  ;;  %v181_v19 = vld [vmem:[#allocation8 + $0x48] sm:$0xff] }
  0x1d   :  { %130 = vmatpush.msra.mxu0 %v107_v5  ;;  %193 = vmatpush.msra.mxu2 %v186_v14  ;;  %v180_v20 = vld [vmem:[#allocation8 + $0x40] sm:$0xff]  ;;  %v179_v21 = vld [vmem:[#allocation8 + $0x38] sm:$0xff]  ;;  %v178_v22 = vld [vmem:[#allocation8 + $0x30] sm:$0xff] }
  0x1e   :  { %273 = vmatmul.msk.f32.vlgmr.msra.gmra.mxu0 %vm111_vm0, %v106_v7  ;;  %162 = vmatpush.msra.mxu1 %v139_v8  ;;  %v177_v23 = vld [vmem:[#allocation8 + $0x28] sm:$0xff]  ;;  %v176_v24 = vld [vmem:[#allocation8 + $0x20] sm:$0xff]  ;;  %v175_v25 = vld [vmem:[#allocation8 + $0x18] sm:$0xff] }
  0x1f   :  { %194 = vmatpush.msra.mxu2 %v185_v15  ;;  %v174_v27 = vld [vmem:[#allocation8 + $0x10] sm:$0xff]  ;;  %v173_v28 = vld [vmem:[#allocation8 + $0x8] sm:$0xff]  ;;  %v172_v29 = vld [vmem:[#allocation8] sm:$0xff] }
  0x20   :  { %163 = vmatpush.msra.mxu1 %v138_v9  ;;  %v228_v30 = vld [vmem:[#allocation10 + $0x78] sm:$0xff]  ;;  %v227_v31 = vld [vmem:[#allocation10 + $0x70] sm:$0xff]  ;;  %v226_v32 = vld [vmem:[#allocation10 + $0x68] sm:$0xff] }
  0x21   :  { %195 = vmatpush.msra.mxu2 %v184_v16  ;;  %233 = vmatpush.msra.mxu3 %v228_v30  ;;  %v225_v33 = vld [vmem:[#allocation10 + $0x60] sm:$0xff]  ;;  %v224_v34 = vld [vmem:[#allocation10 + $0x58] sm:$0xff]  ;;  %v223_v35 = vld [vmem:[#allocation10 + $0x50] sm:$0xff] }
  0x22   :  { %164 = vmatpush.msra.mxu1 %v137_v10  ;;  %v222_v36 = vld [vmem:[#allocation10 + $0x48] sm:$0xff]  ;;  %v221_v37 = vld [vmem:[#allocation10 + $0x40] sm:$0xff]  ;;  %v220_v38 = vld [vmem:[#allocation10 + $0x38] sm:$0xff] }
  0x23   :  { %196 = vmatpush.msra.mxu2 %v183_v17  ;;  %234 = vmatpush.msra.mxu3 %v227_v31  ;;  %v219_v39 = vld [vmem:[#allocation10 + $0x30] sm:$0xff]  ;;  %v218_v40 = vld [vmem:[#allocation10 + $0x28] sm:$0xff]  ;;  %v217_v41 = vld [vmem:[#allocation10 + $0x20] sm:$0xff] }
  0x24   :  { %165 = vmatpush.msra.mxu1 %v136_v11  ;;  %v216_v42 = vld [vmem:[#allocation10 + $0x18] sm:$0xff]  ;;  %v215_v47 = vld [vmem:[#allocation10 + $0x10] sm:$0xff]  ;;  %v214_v48 = vld [vmem:[#allocation10 + $0x8] sm:$0xff] }
  0x25   :  { %197 = vmatpush.msra.mxu2 %v182_v18  ;;  %235 = vmatpush.msra.mxu3 %v226_v32  ;;  %v283_v43 = vld [vmem:[%s521_s3] ss:$0 sm:$0xff]  ;;  %v213_v49 = vld [vmem:[#allocation10] sm:$0xff] }
  0x26   :  { %166 = vmatpush.msra.mxu1 %v135_v12  ;;  %v284_v50 = vld [vmem:[%s523_s5] ss:$0 sm:$0xff] }
  0x27   :  { %198 = vmatpush.msra.mxu2 %v181_v19  ;;  %236 = vmatpush.msra.mxu3 %v225_v33  ;;  %v285_v54 = vld [vmem:[%s525_s7] ss:$0 sm:$0xff] }
  0x29   :  { %199 = vmatpush.msra.mxu2 %v180_v20  ;;  %237 = vmatpush.msra.mxu3 %v224_v34 }
  0x2b   :  { %200 = vmatpush.msra.mxu2 %v179_v21  ;;  %238 = vmatpush.msra.mxu3 %v223_v35 }
  0x2d   :  { %201 = vmatpush.msra.mxu2 %v178_v22  ;;  %239 = vmatpush.msra.mxu3 %v222_v36 }
  0x2f   :  { %202 = vmatpush.msra.mxu2 %v177_v23  ;;  %240 = vmatpush.msra.mxu3 %v221_v37 }
  0x31   :  { %203 = vmatpush.msra.mxu2 %v176_v24  ;;  %241 = vmatpush.msra.mxu3 %v220_v38 }
  0x33   :  { %204 = vmatpush.msra.mxu2 %v175_v25  ;;  %242 = vmatpush.msra.mxu3 %v219_v39 }
  0x35   :  { %205 = vmatpush.msra.mxu2 %v174_v27  ;;  %243 = vmatpush.msra.mxu3 %v218_v40 }
  0x37   :  { %206 = vmatpush.msra.mxu2 %v173_v28  ;;  %244 = vmatpush.msra.mxu3 %v217_v41 }
  0x39   :  { %207 = vmatpush.msra.mxu2 %v172_v29  ;;  %245 = vmatpush.msra.mxu3 %v216_v42 }
  0x3b   :  { %246 = vmatpush.msra.mxu3 %v215_v47 }
  0x3d   :  { %247 = vmatpush.msra.mxu3 %v214_v48 }
  0x3f   :  { %248 = vmatpush.msra.mxu3 %v213_v49 }
  0x9b   :  { %v132_v26 = vpop.f32.mrf.mxu0 }
  0x9c   :  { %274 = vmatmul.msk.f32.vlgmr.msra.gmra.mxu1 %vm147_vm1, %v132_v26 }
 0x119   :  { %v168_v44 = vpop.f32.mrf.mxu1 }
 0x11a   :  { %v169_v45 = vadd.f32 %v283_v43, %v168_v44 }
 0x11c   :  { %v171_v46 = vmax.f32 %v169_v45, 0.0 }
 0x11e   :  { %208 = vmatmul.f32.vlgmr.msra.gmra.mxu2 %v171_v46 }
 0x1a1   :  { %v209_v51 = vpop.f32.mrf.mxu2 }
 0x1a2   :  { %v210_v52 = vadd.f32 %v284_v50, %v209_v51 }
 0x1a4   :  { %v212_v53 = vmax.f32 %v210_v52, 0.0 }
 0x1a6   :  { %249 = vmatmul.f32.vlgmr.msra.gmra.mxu3 %v212_v53 }
 0x229   :  { %v250_v55 = vpop.f32.mrf.mxu3 }
 0x22a   :  { %v251_v56 = vadd.f32 %v285_v54, %v250_v55 }
 0x22c   :  { %253 = vst [vmem:[#allocation11] sm:$0x3] %v251_v56 }
 0x22d   :  { %264 = dma.vmem_to_hbm [thread:$0]  %s260_s11, 32, %s262_s14, [#allocation4]  }
 0x22e   :  { %436 = dma.done.wait [#allocation4], 32  }
 0x22f   :  { %437 = vsyncadd [#allocation4], 4294967264 }
 0x230   :  { %269 = vsyncpa [#allocation3], 1 }
 0x231   :  { %270 = vsyncpa [#allocation6], 1 }
 0x232   :  { %271 = vsyncpa [#allocation9], 1 }
 0x233   :  { %272 = vsyncpa [#allocation4], 1 }

</bundles_post_ra>
